<compile_context>
chip_gen: v5e
topology: v5e:2x2
jax: 0.10.0
libtpu: 0.0.40
codegen_flags: <defaults>
</compile_context>

<pallas_src>
import numpy as np
import jax
import jax.numpy as jnp
from jax.experimental import pallas as pl
from jax.experimental.pallas import tpu as pltpu

MEAN = np.array([0.485, 0.456, 0.406], np.float32)
STD = np.array([0.228, 0.224, 0.225], np.float32)


def _round_up(x, m):
    return ((x + m - 1) // m) * m


# ----------------------------------------------------------------------------
# Host-side glue: crop-parameter sampling + interpolation matrices (numpy only,
# no device syncs).
# ----------------------------------------------------------------------------
def _bilinear_matrix(out_size, in_size, start, length, flip=False):
    """PIL-style (antialiased when downscaling) bilinear resampling matrix
    (out_size, in_size) mapping the source window [start, start+length) to
    out_size samples."""
    scale = length / out_size
    filterscale = max(scale, 1.0)
    support = filterscale  # bilinear kernel half-width after scaling
    lo_bound, hi_bound = start, start + length  # resample inside the crop only
    m = np.zeros((out_size, in_size), np.float64)
    for o in range(out_size):
        center = start + (o + 0.5) * scale
        xmin = max(int(center - support + 0.5), lo_bound)
        xmax = min(int(center + support + 0.5), hi_bound)
        xs = np.arange(xmin, xmax)
        w = np.clip(1.0 - np.abs((xs + 0.5 - center) / filterscale), 0.0, None)
        s = w.sum()
        if xs.size == 0 or s <= 0.0:
            m[o, min(max(int(center), lo_bound), hi_bound - 1)] = 1.0
        else:
            m[o, xs] = w / s
    if flip:
        m = m[::-1]
    return np.ascontiguousarray(m, dtype=np.float32)


def _sample_crop_params(rng, H, W, min_scale, max_scale):
    """torchvision RandomResizedCrop.get_params: random area in
    [min_scale, max_scale] * image area, log-uniform aspect in (3/4, 4/3)."""
    area = H * W
    log_ratio = (np.log(3.0 / 4.0), np.log(4.0 / 3.0))
    for _ in range(10):
        target_area = area * rng.uniform(min_scale, max_scale)
        aspect = np.exp(rng.uniform(*log_ratio))
        w = int(round(np.sqrt(target_area * aspect)))
        h = int(round(np.sqrt(target_area / aspect)))
        if 0 < w <= W and 0 < h <= H:
            y0 = int(rng.integers(0, H - h + 1))
            x0 = int(rng.integers(0, W - w + 1))
            return y0, x0, h, w
    # fallback: (clamped) center crop, like torchvision
    in_ratio = W / H
    if in_ratio < 3.0 / 4.0:
        w = W
        h = min(int(round(w / (3.0 / 4.0))), H)
    elif in_ratio > 4.0 / 3.0:
        h = H
        w = min(int(round(h * (4.0 / 3.0))), W)
    else:
        w, h = W, H
    return (H - h) // 2, (W - w) // 2, h, w


def make_group_matrices(rng, H, W, size, nmb, min_scale, max_scale):
    """RandomResizedCrop + RandomHorizontalFlip for one group, expressed as
    stacked interpolation matrices.  Returns (RY_all (n*size, H),
    RxT_all (n, W, size)) as numpy float32."""
    ry_list, rxt_list = [], []
    for _ in range(nmb):
        y0, x0, ch, cw = _sample_crop_params(rng, H, W, min_scale, max_scale)
        flip = bool(rng.random() < 0.5)
        ry_list.append(_bilinear_matrix(size, H, y0, ch, flip=False))
        rxt_list.append(_bilinear_matrix(size, W, x0, cw, flip=flip).T)
    ry_all = np.stack(ry_list).reshape(nmb * size, H)
    rxt_all = np.stack(rxt_list)  # (n, W, size)
    return ry_all, rxt_all


# ----------------------------------------------------------------------------
# Pallas kernel: one invocation per crop group (no grid; everything resident).
# ----------------------------------------------------------------------------
def _make_group_kernel(n, C, H, W, oh, ow, oh_pad, lanes_pad):
    lanes = n * C * ow

    def kernel(scale_ref, bias_ref, img_ref, ry_ref, rxt_ref, out_ref):
        # img_ref : (H, C*W)  bf16   image, channel-interleaved along lanes
        # ry_ref  : (n*oh, H) bf16   stacked row interpolation matrices
        # rxt_ref : (n, W, ow) bf16  per-crop (transposed) column matrices
        # scale_ref, bias_ref : (C,) f32 scalars in SMEM
        # out_ref : (oh_pad, lanes_pad) f32  lane-dense output slab
        # Stage 1: one MXU matmul covering all crops and channels of the group.
        t = jnp.dot(ry_ref[...], img_ref[...],
                    preferred_element_type=jnp.float32)          # (n*oh, C*W)
        parts = []
        for i in range(n):                                        # static loops
            rxt = rxt_ref[i]                                      # (W, ow)
            for c in range(C):
                blk = t[i * oh:(i + 1) * oh, c * W:(c + 1) * W]   # (oh, W)
                r = jnp.dot(blk.astype(jnp.bfloat16), rxt,
                            preferred_element_type=jnp.float32)   # (oh, ow)
                # Fused Normalize: x * (1/std) + (-mean/std)
                parts.append(r * scale_ref[c] + bias_ref[c])
        slab = jnp.concatenate(parts, axis=-1)                    # (oh, n*C*ow)
        if lanes_pad > lanes:
            slab = jnp.concatenate(
                [slab, jnp.zeros((oh, lanes_pad - lanes), jnp.float32)], axis=-1)
        if oh_pad > oh:
            slab = jnp.concatenate(
                [slab, jnp.zeros((oh_pad - oh, lanes_pad), jnp.float32)], axis=0)
        out_ref[...] = slab                                       # single dense store

    return kernel


def multicrop_group(image, ry_all, rxt_all, scale, bias):
    """All crops of one size group in one Pallas call.
    image: (C,H,W) f32; ry_all: (n*oh,H); rxt_all: (n,W,ow).
    Returns (n, C, oh, ow) f32."""
    C, H, W = image.shape
    n, _, ow = rxt_all.shape
    oh = ry_all.shape[0] // n
    lanes = n * C * ow
    lanes_pad = _round_up(lanes, 128)   # lane-dense, unmasked stores
    oh_pad = _round_up(max(oh, 8), 8)   # full sublanes

    # (C,H,W) -> (H, C*W): lets stage 1 be a single matmul over all channels.
    img2 = jnp.transpose(image, (1, 0, 2)).reshape(H, C * W).astype(jnp.bfloat16)

    out = pl.pallas_call(
        _make_group_kernel(n, C, H, W, oh, ow, oh_pad, lanes_pad),
        out_shape=jax.ShapeDtypeStruct((oh_pad, lanes_pad), jnp.float32),
        in_specs=[
            pl.BlockSpec(memory_space=pltpu.MemorySpace.SMEM),   # scale (C,)
            pl.BlockSpec(memory_space=pltpu.MemorySpace.SMEM),   # bias  (C,)
            pl.BlockSpec(memory_space=pltpu.MemorySpace.VMEM),   # image (H, C*W)
            pl.BlockSpec(memory_space=pltpu.MemorySpace.VMEM),   # RY    (n*oh, H)
            pl.BlockSpec(memory_space=pltpu.MemorySpace.VMEM),   # RxT   (n, W, ow)
        ],
        out_specs=pl.BlockSpec(memory_space=pltpu.MemorySpace.VMEM),
    )(scale, bias, img2,
      jnp.asarray(ry_all, jnp.bfloat16), jnp.asarray(rxt_all, jnp.bfloat16))

    # Unpack the lane-dense slab back to (n, C, oh, ow) at the API boundary.
    crops = out[:oh, :lanes].reshape(oh, n, C, ow).transpose(1, 2, 0, 3)
    return crops


def multicrop_forward(image, size_crops, nmb_crops, min_scale_crops,
                      max_scale_crops, seed=0):
    """Returns a list with one batched (n, C, oh, ow) array per crop group."""
    rng = np.random.default_rng(seed)
    C, H, W = image.shape
    scale = jnp.asarray(1.0 / STD)
    bias = jnp.asarray(-MEAN / STD)
    groups = []
    for g in range(len(size_crops)):
        ry, rxt = make_group_matrices(rng, H, W, size_crops[g], nmb_crops[g],
                                      min_scale_crops[g], max_scale_crops[g])
        groups.append(multicrop_group(image, ry, rxt, scale, bias))
    return groups


def as_crop_list(groups):
    """Flatten per-group slabs to the MultiCrop.forward list-of-crops API."""
    return [crop for group in groups for crop in group]


def _reference(image, ry_all, rxt_all, scale, bias, n, oh):
    img = np.asarray(image, np.float64)
    ry = np.asarray(ry_all, np.float64).reshape(n, oh, -1)
    rxt = np.asarray(rxt_all, np.float64)
    out = np.einsum('noh,chw,nwk->ncok', ry, img, rxt)
    return (out * np.asarray(scale)[None, :, None, None]
            + np.asarray(bias)[None, :, None, None])


if __name__ == "__main__":
    key = jax.random.PRNGKey(0)
    C, H, W = 3, 16, 16
    # Simulated post-ToTensor image in [0, 1].
    image = jax.random.uniform(key, (C, H, W), dtype=jnp.float32)

    size_crops = [8, 4]
    nmb_crops = [2, 4]
    min_scale_crops = [0.5, 0.14]
    max_scale_crops = [1.0, 0.5]

    groups = multicrop_forward(image, size_crops, nmb_crops,
                               min_scale_crops, max_scale_crops, seed=0)
    groups = jax.block_until_ready(groups)

    # Correctness check: regenerate the same matrices (same numpy seed / order)
    # and compare against a float64 numpy reference.
    rng = np.random.default_rng(0)
    scale = jnp.asarray(1.0 / STD)
    bias = jnp.asarray(-MEAN / STD)
    for g in range(len(size_crops)):
        ry, rxt = make_group_matrices(rng, H, W, size_crops[g], nmb_crops[g],
                                      min_scale_crops[g], max_scale_crops[g])
        got = np.asarray(groups[g])
        want = _reference(image, ry, rxt, scale, bias, nmb_crops[g], size_crops[g])
        assert got.shape == (nmb_crops[g], C, size_crops[g], size_crops[g])
        assert np.allclose(got, want, rtol=5e-2, atol=5e-2), f"group {g} mismatch"

    crops = as_crop_list(groups)
    assert len(crops) == sum(nmb_crops)
    assert crops[0].shape == (C, size_crops[0], size_crops[0])
    assert crops[-1].shape == (C, size_crops[1], size_crops[1])
    print("KERNEL_OK")
</pallas_src>

<mosaic_0001>
module attributes {stable_mosaic.version = 11 : i64} {
  func.func @kernel(%arg0: memref<3xf32, #tpu.memory_space<smem>>, %arg1: memref<3xf32, #tpu.memory_space<smem>>, %arg2: memref<16x48xbf16, #tpu.memory_space<vmem>>, %arg3: memref<16x16xbf16, #tpu.memory_space<vmem>>, %arg4: memref<2x16x8xbf16, #tpu.memory_space<vmem>>, %arg5: memref<8x128xf32, #tpu.memory_space<vmem>>) attributes {dimension_semantics = [], scalar_prefetch = 0 : i64, scratch_operands = 0 : i64, tpu.core_type = #tpu.core_type<tc>} {
    %c0 = arith.constant 0 : index
    %c0_0 = arith.constant 0 : index
    %0 = vector.load %arg3[%c0, %c0_0] : memref<16x16xbf16, #tpu.memory_space<vmem>>, vector<16x16xbf16>
    %c0_1 = arith.constant 0 : index
    %c0_2 = arith.constant 0 : index
    %1 = vector.load %arg2[%c0_1, %c0_2] : memref<16x48xbf16, #tpu.memory_space<vmem>>, vector<16x48xbf16>
    %cst = arith.constant dense<0.000000e+00> : vector<16x48xf32>
    %2 = tpu.matmul %0, %1, %cst {dimension_numbers = #tpu.dot_dimension_numbers<[1], [0], [0], [1], [0, 0, 1, 1], [], []>} : vector<16x16xbf16>, vector<16x48xbf16>, vector<16x48xf32> -> vector<16x48xf32>
    %c0_3 = arith.constant 0 : index
    %c0_4 = arith.constant 0 : index
    %c0_5 = arith.constant 0 : index
    %3 = vector.load %arg4[%c0_3, %c0_4, %c0_5] : memref<2x16x8xbf16, #tpu.memory_space<vmem>>, vector<1x16x8xbf16>
    %4 = vector.shape_cast %3 : vector<1x16x8xbf16> to vector<16x8xbf16>
    %5 = vector.extract_strided_slice %2 {offsets = [0, 0], sizes = [8, 16], strides = [1, 1]} : vector<16x48xf32> to vector<8x16xf32>
    %6 = arith.truncf %5 : vector<8x16xf32> to vector<8x16xbf16>
    %cst_6 = arith.constant dense<0.000000e+00> : vector<8x8xf32>
    %7 = tpu.matmul %6, %4, %cst_6 {dimension_numbers = #tpu.dot_dimension_numbers<[1], [0], [0], [1], [0, 0, 1, 1], [], []>} : vector<8x16xbf16>, vector<16x8xbf16>, vector<8x8xf32> -> vector<8x8xf32>
    %c0_7 = arith.constant 0 : index
    %8 = memref.load %arg0[%c0_7] : memref<3xf32, #tpu.memory_space<smem>>
    %9 = vector.broadcast %8 : f32 to vector<8x8xf32>
    %10 = arith.mulf %7, %9 : vector<8x8xf32>
    %c0_8 = arith.constant 0 : index
    %11 = memref.load %arg1[%c0_8] : memref<3xf32, #tpu.memory_space<smem>>
    %12 = vector.broadcast %11 : f32 to vector<8x8xf32>
    %13 = arith.addf %10, %12 : vector<8x8xf32>
    %14 = vector.extract_strided_slice %2 {offsets = [0, 16], sizes = [8, 16], strides = [1, 1]} : vector<16x48xf32> to vector<8x16xf32>
    %15 = arith.truncf %14 : vector<8x16xf32> to vector<8x16xbf16>
    %cst_9 = arith.constant dense<0.000000e+00> : vector<8x8xf32>
    %16 = tpu.matmul %15, %4, %cst_9 {dimension_numbers = #tpu.dot_dimension_numbers<[1], [0], [0], [1], [0, 0, 1, 1], [], []>} : vector<8x16xbf16>, vector<16x8xbf16>, vector<8x8xf32> -> vector<8x8xf32>
    %c1 = arith.constant 1 : index
    %17 = memref.load %arg0[%c1] : memref<3xf32, #tpu.memory_space<smem>>
    %18 = vector.broadcast %17 : f32 to vector<8x8xf32>
    %19 = arith.mulf %16, %18 : vector<8x8xf32>
    %c1_10 = arith.constant 1 : index
    %20 = memref.load %arg1[%c1_10] : memref<3xf32, #tpu.memory_space<smem>>
    %21 = vector.broadcast %20 : f32 to vector<8x8xf32>
    %22 = arith.addf %19, %21 : vector<8x8xf32>
    %23 = vector.extract_strided_slice %2 {offsets = [0, 32], sizes = [8, 16], strides = [1, 1]} : vector<16x48xf32> to vector<8x16xf32>
    %24 = arith.truncf %23 : vector<8x16xf32> to vector<8x16xbf16>
    %cst_11 = arith.constant dense<0.000000e+00> : vector<8x8xf32>
    %25 = tpu.matmul %24, %4, %cst_11 {dimension_numbers = #tpu.dot_dimension_numbers<[1], [0], [0], [1], [0, 0, 1, 1], [], []>} : vector<8x16xbf16>, vector<16x8xbf16>, vector<8x8xf32> -> vector<8x8xf32>
    %c2 = arith.constant 2 : index
    %26 = memref.load %arg0[%c2] : memref<3xf32, #tpu.memory_space<smem>>
    %27 = vector.broadcast %26 : f32 to vector<8x8xf32>
    %28 = arith.mulf %25, %27 : vector<8x8xf32>
    %c2_12 = arith.constant 2 : index
    %29 = memref.load %arg1[%c2_12] : memref<3xf32, #tpu.memory_space<smem>>
    %30 = vector.broadcast %29 : f32 to vector<8x8xf32>
    %31 = arith.addf %28, %30 : vector<8x8xf32>
    %c1_13 = arith.constant 1 : index
    %c0_14 = arith.constant 0 : index
    %c0_15 = arith.constant 0 : index
    %32 = vector.load %arg4[%c1_13, %c0_14, %c0_15] : memref<2x16x8xbf16, #tpu.memory_space<vmem>>, vector<1x16x8xbf16>
    %33 = vector.shape_cast %32 : vector<1x16x8xbf16> to vector<16x8xbf16>
    %34 = vector.extract_strided_slice %2 {offsets = [8, 0], sizes = [8, 16], strides = [1, 1]} : vector<16x48xf32> to vector<8x16xf32>
    %35 = arith.truncf %34 : vector<8x16xf32> to vector<8x16xbf16>
    %cst_16 = arith.constant dense<0.000000e+00> : vector<8x8xf32>
    %36 = tpu.matmul %35, %33, %cst_16 {dimension_numbers = #tpu.dot_dimension_numbers<[1], [0], [0], [1], [0, 0, 1, 1], [], []>} : vector<8x16xbf16>, vector<16x8xbf16>, vector<8x8xf32> -> vector<8x8xf32>
    %c0_17 = arith.constant 0 : index
    %37 = memref.load %arg0[%c0_17] : memref<3xf32, #tpu.memory_space<smem>>
    %38 = vector.broadcast %37 : f32 to vector<8x8xf32>
    %39 = arith.mulf %36, %38 : vector<8x8xf32>
    %c0_18 = arith.constant 0 : index
    %40 = memref.load %arg1[%c0_18] : memref<3xf32, #tpu.memory_space<smem>>
    %41 = vector.broadcast %40 : f32 to vector<8x8xf32>
    %42 = arith.addf %39, %41 : vector<8x8xf32>
    %43 = vector.extract_strided_slice %2 {offsets = [8, 16], sizes = [8, 16], strides = [1, 1]} : vector<16x48xf32> to vector<8x16xf32>
    %44 = arith.truncf %43 : vector<8x16xf32> to vector<8x16xbf16>
    %cst_19 = arith.constant dense<0.000000e+00> : vector<8x8xf32>
    %45 = tpu.matmul %44, %33, %cst_19 {dimension_numbers = #tpu.dot_dimension_numbers<[1], [0], [0], [1], [0, 0, 1, 1], [], []>} : vector<8x16xbf16>, vector<16x8xbf16>, vector<8x8xf32> -> vector<8x8xf32>
    %c1_20 = arith.constant 1 : index
    %46 = memref.load %arg0[%c1_20] : memref<3xf32, #tpu.memory_space<smem>>
    %47 = vector.broadcast %46 : f32 to vector<8x8xf32>
    %48 = arith.mulf %45, %47 : vector<8x8xf32>
    %c1_21 = arith.constant 1 : index
    %49 = memref.load %arg1[%c1_21] : memref<3xf32, #tpu.memory_space<smem>>
    %50 = vector.broadcast %49 : f32 to vector<8x8xf32>
    %51 = arith.addf %48, %50 : vector<8x8xf32>
    %52 = vector.extract_strided_slice %2 {offsets = [8, 32], sizes = [8, 16], strides = [1, 1]} : vector<16x48xf32> to vector<8x16xf32>
    %53 = arith.truncf %52 : vector<8x16xf32> to vector<8x16xbf16>
    %cst_22 = arith.constant dense<0.000000e+00> : vector<8x8xf32>
    %54 = tpu.matmul %53, %33, %cst_22 {dimension_numbers = #tpu.dot_dimension_numbers<[1], [0], [0], [1], [0, 0, 1, 1], [], []>} : vector<8x16xbf16>, vector<16x8xbf16>, vector<8x8xf32> -> vector<8x8xf32>
    %c2_23 = arith.constant 2 : index
    %55 = memref.load %arg0[%c2_23] : memref<3xf32, #tpu.memory_space<smem>>
    %56 = vector.broadcast %55 : f32 to vector<8x8xf32>
    %57 = arith.mulf %54, %56 : vector<8x8xf32>
    %c2_24 = arith.constant 2 : index
    %58 = memref.load %arg1[%c2_24] : memref<3xf32, #tpu.memory_space<smem>>
    %59 = vector.broadcast %58 : f32 to vector<8x8xf32>
    %60 = arith.addf %57, %59 : vector<8x8xf32>
    %61 = tpu.concatenate %13, %22, %31, %42, %51, %60 in 1 : vector<8x8xf32>, vector<8x8xf32>, vector<8x8xf32>, vector<8x8xf32>, vector<8x8xf32>, vector<8x8xf32> -> vector<8x48xf32>
    %cst_25 = arith.constant 0.000000e+00 : f32
    %62 = vector.broadcast %cst_25 : f32 to vector<8x80xf32>
    %63 = tpu.concatenate %61, %62 in 1 : vector<8x48xf32>, vector<8x80xf32> -> vector<8x128xf32>
    %c0_26 = arith.constant 0 : index
    %c0_27 = arith.constant 0 : index
    %64 = vector.load %arg5[%c0_26, %c0_27] : memref<8x128xf32, #tpu.memory_space<vmem>>, vector<8x128xf32>
    tpu.vector_store %arg5[%c0_26, %c0_27], %63 {strides = array<i32>} : memref<8x128xf32, #tpu.memory_space<vmem>>, vector<8x128xf32>,
    return
  }
}

</mosaic_0001>

<bundles_post_ra>
// kernel: tpu_custom_call.1
= control target key start
LH: loop header
LB: loop body
LE: loop exit
PB: predicated region body
PF: predicated region fallthrough
CT: control target
= control target key end

     0   :  { %10 = vsyncpa [#allocation4], 0  ;;  %s445_s0 = inlined_call_operand.vmem [shape: f32[3], index: 0, kind: input, shape index: {}]   ;;  %s446_s1 = inlined_call_operand.vmem [shape: f32[3], index: 1, kind: input, shape index: {}]   ;;  %s447_s2 = inlined_call_operand.vmem [shape: bf16[16,48], index: 2, kind: input, shape index: {}]   ;;  %s448_s3 = inlined_call_operand.vmem [shape: bf16[16,16], index: 3, kind: input, shape index: {}]   ;;  %s449_s4 = inlined_call_operand.vmem [shape: bf16[2,16,8], index: 4, kind: input, shape index: {}]   ;;  %s450_s5 = inlined_call_operand.hbm [shape: f32[8,128], index: 5, kind: output, shape index: {}]  }
   0x1   :  { %11 = vsyncpa [#allocation6], 0 }
   0x2   :  { %12 = vsyncpa [#allocation3], 0  ;;  %s18_s20 = sshll.u32 %s445_s0, 4  ;;  %s27_s23 = sshll.u32 %s446_s1, 4  ;;  %s19_s20 = int_to_ptr.vmem [resolvable:$true] %s18_s20  ;;  %s28_s23 = int_to_ptr.vmem [resolvable:$true] %s27_s23 }
   0x3   :  { %s376_s24 = smov [#allocation2]   ;;  %s377_s25 = smov [#allocation5]  }
   0x4   :  { %21 = dma.vmem_to_smem %s19_s20, 16, %s376_s24, [#allocation4]  }
   0x5   :  { %30 = dma.vmem_to_smem %s28_s23, 16, %s377_s25, [#allocation6]  }
   0x6   :  { %370 = dma.done.wait [#allocation4], 16  }
   0x7   :  { %371 = vsyncadd [#allocation4], 4294967280 }
   0x8   :  { %372 = dma.done.wait [#allocation6], 16  }
   0x9   :  { %373 = vsyncadd [#allocation6], 4294967280 }
   0xa   :  { %45 = sfence }
   0xb   :  { %v309_v0 = vld [vmem:[%s447_s2] sm:$0xff]  ;;  %vm62_vm0 = vcmask 130048   ;;  %v311_v3 = vld [vmem:[%s449_s4 + $0x8] sm:$0xff]  ;;  %s378_s2 = smov 112   ;;  %s108_s7 = sld [smem:[#allocation5]]  ;;  %vm249_vm1 = vcmask 64512  }
   0xc   :  { %v308_v1 = vld [vmem:[%s448_s3] sm:$0xff]  ;;  %73 = vmatpush.bf16.msra.mxu0 %v309_v0  ;;  %s379_s3 = smov 96   ;;  %s380_s8 = smov 24   ;;  %vm252_vm2 = vcmask 195584   ;;  %vm254_vm3 = vcmask 261120   ;;  %vm256_vm4 = vcmask 326656  }
   0xd   :  { %v310_v2 = vld [vmem:[%s449_s4] sm:$0xff]  ;;  %s105_s4 = sld [smem:[#allocation2]]  ;;  %s381_s13 = smov 8   ;;  %vm258_vm5 = vcmask 392192  }
   0xe   :  { %99 = vmatpush.bf16.msra.mxu1 %v310_v2  ;;  %124 = vmatpush.bf16.msra.mxu2 %v310_v2  ;;  %s294_s9 = sld [smem:[#allocation2 + $0x1]]  ;;  %s382_s14 = smov 16  }
   0xf   :  { %287 = vmatmul.msk.bf16.vlgmr.msra.gmra.mxu0 %vm62_vm0, %v308_v1  ;;  %148 = vmatpush.bf16.msra.mxu3 %v310_v2  ;;  %s295_s10 = sld [smem:[#allocation5 + $0x1]]  ;;  %s383_s15 = smov 32  }
  0x10   :  { %180 = vmatpush.bf16.msrb.mxu0 %v311_v3  ;;  %s297_s11 = sld [smem:[#allocation2 + $0x2]]  ;;  %s384_s16 = smov 40  }
  0x11   :  { %v109_v13 = vstv %s108_s7  ;;  %s298_s12 = sld [smem:[#allocation5 + $0x2]]  ;;  %s385_s17 = smov [#allocation7]  }
  0x12   :  { %201 = vmatpush.bf16.msrb.mxu1 %v311_v3  ;;  %221 = vmatpush.bf16.msrb.mxu2 %v311_v3  ;;  %s266_s18 = sshll.u32 %s385_s17, 4  ;;  %s268_s21 = sshll.u32 %s450_s5, 4  ;;  %s267_s18 = int_to_ptr.vmem [resolvable:$true] %s266_s18  ;;  %s269_s21 = int_to_ptr.hbm [resolvable:$true] %s268_s21 }
  0x13   :  { %v106_v11 = vstv %s105_s4 }
  0x14   :  { %v131_v22 = vstv %s294_s9 }
  0x15   :  { %v134_v24 = vstv %s295_s10 }
  0x16   :  { %v155_v27 = vstv %s297_s11 }
  0x17   :  { %v158_v30 = vstv %s298_s12 }
  0x8c   :  { %v75_v4 = vpop.f32.mrf.mxu0 }
  0x8d   :  { %v82_v5 = vpack.c.bf16 %v75_v4, %v75_v4 }
  0x8f   :  { %112 = vrot.lane.b32.xlu0 %v82_v5, %s378_s2  ;;  %292 = vmatmul.msk.bf16.vlgmr.msra.gmra.mxu1 %vm62_vm0, %v82_v5 }
  0x94   :  { %v77_v6 = vpop.f32.mrf.mxu0 }
  0x95   :  { %v163_v7 = vpack.c.bf16 %v77_v6, %v77_v6 }
  0x97   :  { %136 = vrot.lane.b32.xlu0 %v82_v5, %s379_s3  ;;  %209 = vrot.lane.b32.xlu1 %v163_v7, %s379_s3 }
  0x98   :  { %305 = vmatmul.msk.bf16.vlgmr.msrb.gmra.mxu0 %vm62_vm0, %v163_v7 }
  0x9f   :  { %189 = vrot.lane.b32.xlu1 %v163_v7, %s378_s2 }
 0x101   :  { %v113_v8 = vpop.permute.xlu0 %112 }
 0x102   :  { %293 = vmatmul.msk.bf16.vlgmr.msra.gmra.mxu2 %vm62_vm0, %v113_v8 }
 0x109   :  { %v137_v9 = vpop.permute.xlu0 %136  ;;  %v210_v10 = vpop.permute.xlu1 %209 }
 0x10a   :  { %296 = vmatmul.msk.bf16.vlgmr.msra.gmra.mxu3 %vm62_vm0, %v137_v9 }
 0x10c   :  { %v101_v12 = vpop.f32.mrf.mxu1 }
 0x10d   :  { %v107_v14 = vmul.f32 %v106_v11, %v101_v12 }
 0x10f   :  { %v110_v15 = vadd.f32 %v109_v13, %v107_v14 }
 0x111   :  { %v190_v16 = vpop.permute.xlu1 %189 }
 0x112   :  { %306 = vmatmul.msk.bf16.vlgmr.msrb.gmra.mxu1 %vm62_vm0, %v190_v16  ;;  %307 = vmatmul.msk.bf16.vlgmr.msrb.gmra.mxu2 %vm62_vm0, %v210_v10 }
 0x114   :  { %v103_v17 = vpop.f32.mrf.mxu1 }
 0x115   :  { %v182_v18 = vpop.f32.mrf.mxu0 }
 0x116   :  { %v186_v19 = vmul.f32 %v182_v18, %v106_v11 }
 0x118   :  { %v187_v20 = vadd.f32 %v186_v19, %v109_v13 }
 0x11a   :  { %238 = vrot.lane.b32.xlu0 %v187_v20, %s380_s8 }
 0x11d   :  { %v184_v21 = vpop.f32.mrf.mxu0 }
 0x185   :  { %v126_v23 = vpop.f32.mrf.mxu2 }
 0x186   :  { %v132_v25 = vmul.f32 %v131_v22, %v126_v23 }
 0x188   :  { %v135_v26 = vadd.f32 %v134_v24, %v132_v25 }
 0x18a   :  { %230 = vrot.lane.b32.xlu2 %v135_v26, %s381_s13 }
 0x18c   :  { %v239_v46 = vpop.permute.xlu0 %238 }
 0x18d   :  { %v128_v28 = vpop.f32.mrf.mxu2  ;;  %v150_v29 = vpop.f32.mrf.mxu3 }
 0x18e   :  { %v156_v31 = vmul.f32 %v155_v27, %v150_v29 }
 0x18f   :  { %v203_v32 = vpop.f32.mrf.mxu1 }
 0x190   :  { %v159_v33 = vadd.f32 %v158_v30, %v156_v31  ;;  %v207_v34 = vmul.f32 %v203_v32, %v131_v22 }
 0x192   :  { %v208_v35 = vadd.f32 %v207_v34, %v134_v24  ;;  %234 = vrot.lane.b32.xlu2 %v159_v33, %s382_s14 }
 0x194   :  { %242 = vrot.lane.b32.xlu1 %v208_v35, %s383_s15 }
 0x195   :  { %v152_v36 = vpop.f32.mrf.mxu3  ;;  %v223_v37 = vpop.f32.mrf.mxu2 }
 0x196   :  { %v227_v38 = vmul.f32 %v223_v37, %v155_v27 }
 0x197   :  { %v205_v39 = vpop.f32.mrf.mxu1 }
 0x198   :  { %v228_v40 = vadd.f32 %v227_v38, %v158_v30 }
 0x19a   :  { %246 = vrot.lane.b32.xlu2 %v228_v40, %s384_s16 }
 0x19d   :  { %v225_v41 = vpop.f32.mrf.mxu2 }
 0x1e4   :  { %v231_v42 = vpop.permute.xlu2 %230 }
 0x1e5   :  { %v250_v44 = vsel %vm249_vm1, %v110_v15, %v231_v42 }
 0x1ec   :  { %v235_v43 = vpop.permute.xlu2 %234 }
 0x1ed   :  { %v251_v45 = vsel %vm62_vm0, %v250_v44, %v235_v43 }
 0x1ee   :  { %v253_v48 = vsel %vm252_vm2, %v251_v45, %v239_v46 }
 0x1f4   :  { %v247_v49 = vpop.permute.xlu2 %246 }
 0x206   :  { %v243_v47 = vpop.permute.xlu1 %242 }
 0x207   :  { %v255_v50 = vsel %vm254_vm3, %v253_v48, %v243_v47 }
 0x208   :  { %v257_v51 = vsel %vm256_vm4, %v255_v50, %v247_v49 }
 0x209   :  { %v259_v52 = vsel %vm258_vm5, %v257_v51, 0.0 }
 0x20a   :  { %260 = vst [vmem:[#allocation7] sm:$0xff] %v259_v52 }
 0x20b   :  { %271 = dma.vmem_to_hbm [thread:$0]  %s267_s18, 128, %s269_s21, [#allocation3]  }
 0x20c   :  { %374 = dma.done.wait [#allocation3], 128  }
 0x20d   :  { %375 = vsyncadd [#allocation3], 4294967168 }
 0x20e   :  { %276 = vsyncpa [#allocation3], 1 }
 0x20f   :  { %277 = vsyncpa [#allocation4], 1 }
 0x210   :  { %278 = vsyncpa [#allocation6], 1 }

</bundles_post_ra>
